<compile_context>
chip_gen: v7x
topology: tpu7x:2x2x1
jax: 0.10.0
libtpu: 0.0.40
codegen_flags: <defaults>
</compile_context>

<pallas_src>
import functools

import numpy as np
import jax
import jax.numpy as jnp
from jax import lax
from jax.experimental import pallas as pl
from jax.experimental.pallas import tpu as pltpu

SIGMA = 0.8                 # entropy_BRM(sigma=0.8)
EPS = 1e-8                  # torch.nn.CosineSimilarity default eps
_LOG_NORM = float(np.log(SIGMA) + 0.5 * np.log(2.0 * np.pi))
_INV_2S2 = float(1.0 / (2.0 * SIGMA * SIGMA))
_NEG = -1e30                # mask value for padded rows / columns


def _round_up(x, m):
    return ((x + m - 1) // m) * m


def _cdiv(a, b):
    return -(-a // b)


def _entropy_brm_kernel(ex_ref, ey_ref, ent1_ref, colmax_ref, rowmax_sc,
                        *, M, N, precision):
    """One (i, j) tile of the (M, N) cosine matrix.

    Inputs are pre-normalized rows, so the MXU contraction *is* the cosine
    similarity.  Emits per-block column maxima (lane-dense) and, on the last
    inner step, the per-row-block entropy partial.
    """
    i = pl.program_id(0)                      # M-block index (outer, parallel)
    j = pl.program_id(1)                      # N-block index (inner, arbitrary)
    nm = pl.num_programs(0)
    nn = pl.num_programs(1)

    ex = ex_ref[...]                          # (tm, Dp), pre-normalized rows
    ey = ey_ref[...]                          # (tn, Dp), pre-normalized rows
    tm = ex.shape[0]
    tn = ey.shape[0]
    m_rem = M % tm                            # static: row padding only if != 0
    n_rem = N % tn                            # static: col padding only if != 0

    # --- MXU: contract last dims (no explicit transpose); f32 accumulate. ---
    C = lax.dot_general(ex, ey, (((1,), (1,)), ((), ())),
                        preferred_element_type=jnp.float32,
                        precision=precision)                     # (tm, tn)

    # --- per-block column maxima -> lane-dense output (merged in wrapper). ---
    # Padded rows only exist in the last i block, so the mask pass is gated.
    if m_rem == 0:
        colmax_ref[...] = jnp.max(C, axis=0, keepdims=True)[None]
    else:
        @pl.when(i != nm - 1)
        def _():
            colmax_ref[...] = jnp.max(C, axis=0, keepdims=True)[None]

        @pl.when(i == nm - 1)
        def _():
            row_ids = i * tm + lax.broadcasted_iota(jnp.int32, (tm, 1), 0)
            row_bias = jnp.where(row_ids < M, 0.0, _NEG)          # (tm, 1)
            colmax_ref[...] = jnp.max(C + row_bias, axis=0,
                                      keepdims=True)[None]

    # --- online row max across the inner N axis. ---
    @pl.when(j == 0)
    def _():
        rowmax_sc[...] = jnp.full_like(rowmax_sc, _NEG)

    if n_rem == 0:
        rowmax_sc[...] = jnp.maximum(rowmax_sc[...],
                                     jnp.max(C, axis=1, keepdims=True))
    else:
        @pl.when(j != nn - 1)
        def _():
            rowmax_sc[...] = jnp.maximum(rowmax_sc[...],
                                         jnp.max(C, axis=1, keepdims=True))

        @pl.when(j == nn - 1)
        def _():
            col_ids = j * tn + lax.broadcasted_iota(jnp.int32, (1, tn), 1)
            col_bias = jnp.where(col_ids < N, 0.0, _NEG)          # (1, tn)
            rowmax_sc[...] = jnp.maximum(
                rowmax_sc[...],
                jnp.max(C + col_bias, axis=1, keepdims=True))

    # --- finalize this row block on the last inner step. ---
    @pl.when(j == nn - 1)
    def _():
        rmax = rowmax_sc[...]                                     # (tm, 1)
        if m_rem != 0:
            row_ids = i * tm + lax.broadcasted_iota(jnp.int32, (tm, 1), 0)
            row_valid = row_ids < M                               # (tm, 1)
            rmax = jnp.where(row_valid, rmax, 0.0)
        c1 = -(rmax * rmax) * _INV_2S2 - _LOG_NORM
        term = jnp.exp(c1) * c1
        if m_rem != 0:
            term = jnp.where(row_valid, term, 0.0)
        ent1_ref[...] = jnp.full(ent1_ref.shape, -jnp.sum(term),
                                 dtype=jnp.float32)


@functools.partial(jax.jit, static_argnames=("tm", "tn"))
def entropy_brm(ex, ey, *, tm=512, tn=512):
    """Pallas implementation of entropy_BRM(sigma=0.8, dim=None).forward(ex, ey)."""
    M, D = ex.shape
    N, D2 = ey.shape
    assert D == D2, "ex and ey must share the feature dimension"

    Dp = _round_up(D, 128)
    itemsize = jnp.dtype(ex.dtype).itemsize

    # ---- tile selection -----------------------------------------------------
    # Big tiles amortize the ~0.35 us per-grid-step overhead; clamp to the
    # (aligned) problem size and to a VMEM budget that stays safe for v7x's
    # 64 MiB VMEM (double-buffered operand slabs + f32 tile working set).
    tm = max(16, min(tm, _round_up(M, 16)))
    tn = max(128, min(tn, _round_up(N, 128)))
    vmem_budget = 28 * 1024 * 1024
    while (2 * (tm + tn) * Dp * itemsize + 2 * tm * tn * 4) > vmem_budget:
        if tn > 256:
            tn = _round_up(tn // 2, 128)
        elif tm > 128:
            tm = _round_up(tm // 2, 16)
        else:
            break
    # TODO(synk): add a K (D) grid axis with dot accumulation for very large D
    #             instead of shrinking tm/tn (full-D operand slabs in VMEM now).

    # Balance the blocks (keeps megacore load even when M barely exceeds tm)
    # and enforce hardware tiling alignment.
    nm = _cdiv(M, tm)
    tm = _round_up(_cdiv(M, nm), 16)
    nn = _cdiv(N, tn)
    tn = _round_up(_cdiv(N, nn), 128)
    Mp, Np = nm * tm, nn * tn

    # ---- hoisted normalization (fused with the padding) ---------------------
    def _normalize_pad(x, rows_to):
        x32 = x.astype(jnp.float32)
        inv = lax.rsqrt(jnp.maximum(jnp.sum(x32 * x32, axis=-1, keepdims=True),
                                    EPS * EPS))
        xn = (x32 * inv).astype(x.dtype)
        return jnp.pad(xn, ((0, rows_to - x.shape[0]), (0, Dp - x.shape[1])))

    ex_p = _normalize_pad(ex, Mp)
    ey_p = _normalize_pad(ey, Np)

    # For f32 inputs, DEFAULT MXU precision truncates the operands to bf16;
    # keep full precision for the cosine maxima.  bf16 stays on the fast path.
    precision = (lax.Precision.HIGHEST if ex_p.dtype == jnp.float32
                 else lax.Precision.DEFAULT)

    kernel = functools.partial(_entropy_brm_kernel, M=M, N=N,
                               precision=precision)

    ent1_part, colmax_part = pl.pallas_call(
        kernel,
        out_shape=(
            jax.ShapeDtypeStruct((nm, 1, 128), jnp.float32),  # row-block entropy partials
            jax.ShapeDtypeStruct((nm, 1, Np), jnp.float32),   # per-block column maxima
        ),
        grid_spec=pltpu.PrefetchScalarGridSpec(
            num_scalar_prefetch=0,
            grid=(nm, nn),
            in_specs=[
                # ex block is resident across the inner j axis; ey streams.
                pl.BlockSpec((tm, Dp), lambda i, j: (i, 0)),
                pl.BlockSpec((tn, Dp), lambda i, j: (j, 0)),
            ],
            out_specs=[
                pl.BlockSpec((1, 1, 128), lambda i, j: (i, 0, 0)),
                pl.BlockSpec((1, 1, tn), lambda i, j: (i, 0, j)),
            ],
            scratch_shapes=[pltpu.VMEM((tm, 1), jnp.float32)],  # running row max
        ),
        compiler_params=pltpu.CompilerParams(
            dimension_semantics=("parallel", "arbitrary"),
            vmem_limit_bytes=40 * 1024 * 1024,
        ),
        cost_estimate=pl.CostEstimate(
            flops=2 * Mp * Np * Dp,
            transcendentals=Mp,
            # ey is re-streamed once per row block.
            bytes_accessed=(Mp * Dp + nm * Np * Dp) * itemsize
                           + (nm * 128 + nm * Np) * 4,
        ),
    )(ex_p, ey_p)

    # ---- tiny O(M + N) epilogue: merge partials ------------------------------
    out1 = jnp.sum(ent1_part[:, 0, 0])

    # TODO(synk): hierarchical in-kernel colmax merge if nm grows into hundreds.
    colmax = jnp.max(colmax_part[:, 0, :], axis=0)[:N]                 # (N,)
    c2 = -(colmax * colmax) * _INV_2S2 - _LOG_NORM
    out2 = -jnp.sum(jnp.exp(c2) * c2)
    return out1, out2


def entropy_brm_ref(ex, ey):
    """Pure-JAX reference mirroring the PyTorch forward (dim=None)."""
    ex = ex.astype(jnp.float32)
    ey = ey.astype(jnp.float32)
    dot = jnp.matmul(ex, ey.T, precision=jax.lax.Precision.HIGHEST)
    nx = jnp.linalg.norm(ex, axis=-1, keepdims=True)
    ny = jnp.linalg.norm(ey, axis=-1, keepdims=True)
    C = dot / jnp.maximum(nx * ny.T, EPS)

    def logp(c):
        return -(c * c) * _INV_2S2 - _LOG_NORM

    C1 = logp(jnp.max(C, axis=-1))
    C2 = logp(jnp.max(C, axis=0))
    return -jnp.sum(jnp.exp(C1) * C1), -jnp.sum(jnp.exp(C2) * C2)


if __name__ == "__main__":
    key = jax.random.PRNGKey(0)
    k1, k2, k3, k4, k5, k6 = jax.random.split(key, 6)

    # Small embedding batches (module-scale example).
    M, N, D = 8, 16, 32
    ex = jax.random.normal(k1, (M, D), dtype=jnp.float32)
    ey = jax.random.normal(k2, (N, D), dtype=jnp.float32)
    out1, out2 = entropy_brm(ex, ey)
    jax.block_until_ready((out1, out2))
    ref1, ref2 = entropy_brm_ref(ex, ey)
    np.testing.assert_allclose(np.asarray(out1), np.asarray(ref1), rtol=1e-4, atol=1e-5)
    np.testing.assert_allclose(np.asarray(out2), np.asarray(ref2), rtol=1e-4, atol=1e-5)

    # Unaligned single-block shapes: exercises edge-row / edge-column masking.
    M2, N2, D2 = 300, 333, 96
    ex2 = jax.random.normal(k3, (M2, D2), dtype=jnp.float32)
    ey2 = jax.random.normal(k4, (N2, D2), dtype=jnp.float32)
    o1, o2 = entropy_brm(ex2, ey2)
    jax.block_until_ready((o1, o2))
    r1, r2 = entropy_brm_ref(ex2, ey2)
    np.testing.assert_allclose(np.asarray(o1), np.asarray(r1), rtol=1e-3, atol=1e-4)
    np.testing.assert_allclose(np.asarray(o2), np.asarray(r2), rtol=1e-3, atol=1e-4)

    # Multi-block grid with padding on both axes: exercises gated edge masks,
    # the online row-max across j, and the cross-row-block colmax merge.
    M3, N3, D3 = 1100, 777, 200
    ex3 = jax.random.normal(k5, (M3, D3), dtype=jnp.float32)
    ey3 = jax.random.normal(k6, (N3, D3), dtype=jnp.float32)
    p1, p2 = entropy_brm(ex3, ey3)
    jax.block_until_ready((p1, p2))
    q1, q2 = entropy_brm_ref(ex3, ey3)
    np.testing.assert_allclose(np.asarray(p1), np.asarray(q1), rtol=1e-3, atol=1e-4)
    np.testing.assert_allclose(np.asarray(p2), np.asarray(q2), rtol=1e-3, atol=1e-4)

    print("KERNEL_OK")
</pallas_src>

<mosaic_0001>
module attributes {stable_mosaic.version = 11 : i64} {
  func.func @_entropy_brm_kernel(%arg0: i32, %arg1: i32, %arg2: memref<16x128xf32, #tpu.memory_space<vmem>>, %arg3: memref<128x128xf32, #tpu.memory_space<vmem>>, %arg4: memref<1x1x128xf32, #tpu.memory_space<vmem>>, %arg5: memref<1x1x128xf32, #tpu.memory_space<vmem>>, %arg6: memref<16x1xf32, #tpu.memory_space<vmem>>) attributes {dimension_semantics = [#tpu.dimension_semantics<parallel>, #tpu.dimension_semantics<arbitrary>], iteration_bounds = array<i64: 1, 1>, scalar_prefetch = 0 : i64, scratch_operands = 1 : i64, tpu.core_type = #tpu.core_type<tc>, window_params = [{transform_indices = @transform_0, window_bounds = array<i64: 16, 128>}, {transform_indices = @transform_1, window_bounds = array<i64: 128, 128>}, {transform_indices = @transform_2, window_bounds = array<i64: 1, 1, 128>}, {transform_indices = @transform_3, window_bounds = array<i64: 1, 1, 128>}]} {
    %c0 = arith.constant 0 : index
    %c0_0 = arith.constant 0 : index
    %0 = vector.load %arg2[%c0, %c0_0] : memref<16x128xf32, #tpu.memory_space<vmem>>, vector<16x128xf32>
    %c0_1 = arith.constant 0 : index
    %c0_2 = arith.constant 0 : index
    %1 = vector.load %arg3[%c0_1, %c0_2] : memref<128x128xf32, #tpu.memory_space<vmem>>, vector<128x128xf32>
    %cst = arith.constant dense<0.000000e+00> : vector<16x128xf32>
    %2 = tpu.matmul %0, %1, %cst {dimension_numbers = #tpu.dot_dimension_numbers<[1], [1], [0], [0], [0, 0, 1, 0], [], []>, precision = #tpu.contract_precision<fp32>} : vector<16x128xf32>, vector<128x128xf32>, vector<16x128xf32> -> vector<16x128xf32>
    %c0_i32 = arith.constant 0 : i32
    %3 = arith.cmpi ne, %arg0, %c0_i32 : i32
    %4 = arith.extui %3 : i1 to i32
    %c0_i32_3 = arith.constant 0 : i32
    %5 = arith.cmpi ne, %4, %c0_i32_3 : i32
    scf.if %5 {
      %cst_14 = arith.constant dense<0xFF800000> : vector<128xf32>
      %21 = vector.multi_reduction <maximumf>, %2, %cst_14 [0] : vector<16x128xf32> to vector<128xf32>
      %22 = vector.shape_cast %21 : vector<128xf32> to vector<1x128xf32>
      %23 = vector.shape_cast %22 : vector<1x128xf32> to vector<1x1x128xf32>
      %c0_15 = arith.constant 0 : index
      %c0_16 = arith.constant 0 : index
      %c0_17 = arith.constant 0 : index
      %24 = vector.load %arg5[%c0_15, %c0_16, %c0_17] : memref<1x1x128xf32, #tpu.memory_space<vmem>>, vector<1x1x128xf32>
      tpu.vector_store %arg5[%c0_15, %c0_16, %c0_17], %23 {strides = array<i32>} : memref<1x1x128xf32, #tpu.memory_space<vmem>>, vector<1x1x128xf32>,
    } else {
    }
    %c0_i32_4 = arith.constant 0 : i32
    %6 = arith.cmpi eq, %arg0, %c0_i32_4 : i32
    %7 = arith.extui %6 : i1 to i32
    %c0_i32_5 = arith.constant 0 : i32
    %8 = arith.cmpi ne, %7, %c0_i32_5 : i32
    scf.if %8 {
      %c16_i32 = arith.constant 16 : i32
      %21 = arith.muli %arg0, %c16_i32 : i32
      %22 = tpu.iota {dimensions = array<i32: 0>} : vector<16x1xi32>
      %23 = vector.broadcast %21 : i32 to vector<16x1xi32>
      %24 = arith.addi %23, %22 : vector<16x1xi32>
      %c8_i32 = arith.constant 8 : i32
      %25 = vector.broadcast %c8_i32 : i32 to vector<16x1xi32>
      %26 = arith.cmpi slt, %24, %25 : vector<16x1xi32>
      %cst_14 = arith.constant 0.000000e+00 : f32
      %cst_15 = arith.constant -1.000000e+30 : f32
      %27 = vector.broadcast %cst_14 : f32 to vector<16x1xf32>
      %28 = vector.broadcast %cst_15 : f32 to vector<16x1xf32>
      %29 = arith.select %26, %27, %28 : vector<16x1xi1>, vector<16x1xf32>
      %30 = vector.broadcast %29 : vector<16x1xf32> to vector<16x128xf32>
      %31 = arith.addf %2, %30 : vector<16x128xf32>
      %cst_16 = arith.constant dense<0xFF800000> : vector<128xf32>
      %32 = vector.multi_reduction <maximumf>, %31, %cst_16 [0] : vector<16x128xf32> to vector<128xf32>
      %33 = vector.shape_cast %32 : vector<128xf32> to vector<1x128xf32>
      %34 = vector.shape_cast %33 : vector<1x128xf32> to vector<1x1x128xf32>
      %c0_17 = arith.constant 0 : index
      %c0_18 = arith.constant 0 : index
      %c0_19 = arith.constant 0 : index
      %35 = vector.load %arg5[%c0_17, %c0_18, %c0_19] : memref<1x1x128xf32, #tpu.memory_space<vmem>>, vector<1x1x128xf32>
      tpu.vector_store %arg5[%c0_17, %c0_18, %c0_19], %34 {strides = array<i32>} : memref<1x1x128xf32, #tpu.memory_space<vmem>>, vector<1x1x128xf32>,
    } else {
    }
    %c0_i32_6 = arith.constant 0 : i32
    %9 = arith.cmpi eq, %arg1, %c0_i32_6 : i32
    %10 = arith.extui %9 : i1 to i32
    %c0_i32_7 = arith.constant 0 : i32
    %11 = arith.cmpi ne, %10, %c0_i32_7 : i32
    scf.if %11 {
      %cst_14 = arith.constant -1.000000e+30 : f32
      %21 = vector.broadcast %cst_14 : f32 to vector<16x1xf32>
      %c0_15 = arith.constant 0 : index
      %c0_16 = arith.constant 0 : index
      %22 = vector.load %arg6[%c0_15, %c0_16] : memref<16x1xf32, #tpu.memory_space<vmem>>, vector<16x1xf32>
      tpu.vector_store %arg6[%c0_15, %c0_16], %21 {strides = array<i32>} : memref<16x1xf32, #tpu.memory_space<vmem>>, vector<16x1xf32>,
    } else {
    }
    %c0_i32_8 = arith.constant 0 : i32
    %12 = arith.cmpi ne, %arg1, %c0_i32_8 : i32
    %13 = arith.extui %12 : i1 to i32
    %c0_i32_9 = arith.constant 0 : i32
    %14 = arith.cmpi ne, %13, %c0_i32_9 : i32
    scf.if %14 {
      %c0_14 = arith.constant 0 : index
      %c0_15 = arith.constant 0 : index
      %21 = vector.load %arg6[%c0_14, %c0_15] : memref<16x1xf32, #tpu.memory_space<vmem>>, vector<16x1xf32>
      %cst_16 = arith.constant dense<0xFF800000> : vector<16xf32>
      %22 = vector.multi_reduction <maximumf>, %2, %cst_16 [1] : vector<16x128xf32> to vector<16xf32>
      %23 = vector.shape_cast %22 : vector<16xf32> to vector<16x1xf32>
      %24 = arith.maximumf %21, %23 : vector<16x1xf32>
      %c0_17 = arith.constant 0 : index
      %c0_18 = arith.constant 0 : index
      %25 = vector.load %arg6[%c0_17, %c0_18] : memref<16x1xf32, #tpu.memory_space<vmem>>, vector<16x1xf32>
      tpu.vector_store %arg6[%c0_17, %c0_18], %24 {strides = array<i32>} : memref<16x1xf32, #tpu.memory_space<vmem>>, vector<16x1xf32>,
    } else {
    }
    %c0_i32_10 = arith.constant 0 : i32
    %15 = arith.cmpi eq, %arg1, %c0_i32_10 : i32
    %16 = arith.extui %15 : i1 to i32
    %c0_i32_11 = arith.constant 0 : i32
    %17 = arith.cmpi ne, %16, %c0_i32_11 : i32
    scf.if %17 {
      %c128_i32 = arith.constant 128 : i32
      %21 = arith.muli %arg1, %c128_i32 : i32
      %22 = tpu.iota {dimensions = array<i32: 1>} : vector<1x128xi32>
      %23 = vector.broadcast %21 : i32 to vector<1x128xi32>
      %24 = arith.addi %23, %22 : vector<1x128xi32>
      %c16_i32 = arith.constant 16 : i32
      %25 = vector.broadcast %c16_i32 : i32 to vector<1x128xi32>
      %26 = arith.cmpi slt, %24, %25 : vector<1x128xi32>
      %cst_14 = arith.constant 0.000000e+00 : f32
      %cst_15 = arith.constant -1.000000e+30 : f32
      %27 = vector.broadcast %cst_14 : f32 to vector<1x128xf32>
      %28 = vector.broadcast %cst_15 : f32 to vector<1x128xf32>
      %29 = arith.select %26, %27, %28 : vector<1x128xi1>, vector<1x128xf32>
      %c0_16 = arith.constant 0 : index
      %c0_17 = arith.constant 0 : index
      %30 = vector.load %arg6[%c0_16, %c0_17] : memref<16x1xf32, #tpu.memory_space<vmem>>, vector<16x1xf32>
      %31 = vector.broadcast %29 : vector<1x128xf32> to vector<16x128xf32>
      %32 = arith.addf %2, %31 : vector<16x128xf32>
      %cst_18 = arith.constant dense<0xFF800000> : vector<16xf32>
      %33 = vector.multi_reduction <maximumf>, %32, %cst_18 [1] : vector<16x128xf32> to vector<16xf32>
      %34 = vector.shape_cast %33 : vector<16xf32> to vector<16x1xf32>
      %35 = arith.maximumf %30, %34 : vector<16x1xf32>
      %c0_19 = arith.constant 0 : index
      %c0_20 = arith.constant 0 : index
      %36 = vector.load %arg6[%c0_19, %c0_20] : memref<16x1xf32, #tpu.memory_space<vmem>>, vector<16x1xf32>
      tpu.vector_store %arg6[%c0_19, %c0_20], %35 {strides = array<i32>} : memref<16x1xf32, #tpu.memory_space<vmem>>, vector<16x1xf32>,
    } else {
    }
    %c0_i32_12 = arith.constant 0 : i32
    %18 = arith.cmpi eq, %arg1, %c0_i32_12 : i32
    %19 = arith.extui %18 : i1 to i32
    %c0_i32_13 = arith.constant 0 : i32
    %20 = arith.cmpi ne, %19, %c0_i32_13 : i32
    scf.if %20 {
      %c0_14 = arith.constant 0 : index
      %c0_15 = arith.constant 0 : index
      %21 = vector.load %arg6[%c0_14, %c0_15] : memref<16x1xf32, #tpu.memory_space<vmem>>, vector<16x1xf32>
      %c16_i32 = arith.constant 16 : i32
      %22 = arith.muli %arg0, %c16_i32 : i32
      %23 = tpu.iota {dimensions = array<i32: 0>} : vector<16x1xi32>
      %24 = vector.broadcast %22 : i32 to vector<16x1xi32>
      %25 = arith.addi %24, %23 : vector<16x1xi32>
      %c8_i32 = arith.constant 8 : i32
      %26 = vector.broadcast %c8_i32 : i32 to vector<16x1xi32>
      %27 = arith.cmpi slt, %25, %26 : vector<16x1xi32>
      %cst_16 = arith.constant 0.000000e+00 : f32
      %28 = vector.broadcast %cst_16 : f32 to vector<16x1xf32>
      %29 = arith.select %27, %21, %28 : vector<16x1xi1>, vector<16x1xf32>
      %30 = arith.mulf %29, %29 : vector<16x1xf32>
      %cst_17 = arith.constant 0.000000e+00 : f32
      %31 = vector.broadcast %cst_17 : f32 to vector<16x1xf32>
      %32 = arith.subf %31, %30 : vector<16x1xf32>
      %cst_18 = arith.constant 7.812500e-01 : f32
      %33 = vector.broadcast %cst_18 : f32 to vector<16x1xf32>
      %34 = arith.mulf %32, %33 : vector<16x1xf32>
      %cst_19 = arith.constant 0.695794999 : f32
      %35 = vector.broadcast %cst_19 : f32 to vector<16x1xf32>
      %36 = arith.subf %34, %35 : vector<16x1xf32>
      %37 = math.exp %36 : vector<16x1xf32>
      %38 = arith.mulf %37, %36 : vector<16x1xf32>
      %cst_20 = arith.constant 0.000000e+00 : f32
      %39 = vector.broadcast %cst_20 : f32 to vector<16x1xf32>
      %40 = arith.select %27, %38, %39 : vector<16x1xi1>, vector<16x1xf32>
      %41 = vector.shape_cast %40 : vector<16x1xf32> to vector<1x16x1xf32>
      %cst_21 = arith.constant dense<0.000000e+00> : vector<1xf32>
      %42 = vector.multi_reduction <add>, %41, %cst_21 [1, 2] : vector<1x16x1xf32> to vector<1xf32>
      %43 = vector.shape_cast %42 : vector<1xf32> to vector<1x1x1xf32>
      %44 = vector.extract %43[0, 0, 0] : f32 from vector<1x1x1xf32>
      %cst_22 = arith.constant 0.000000e+00 : f32
      %45 = arith.subf %cst_22, %44 : f32
      %46 = vector.broadcast %45 : f32 to vector<1x1x128xf32>
      %c0_23 = arith.constant 0 : index
      %c0_24 = arith.constant 0 : index
      %c0_25 = arith.constant 0 : index
      %47 = vector.load %arg4[%c0_23, %c0_24, %c0_25] : memref<1x1x128xf32, #tpu.memory_space<vmem>>, vector<1x1x128xf32>
      tpu.vector_store %arg4[%c0_23, %c0_24, %c0_25], %46 {strides = array<i32>} : memref<1x1x128xf32, #tpu.memory_space<vmem>>, vector<1x1x128xf32>,
    } else {
    }
    return
  }
  func.func @transform_0(%arg0: i32, %arg1: i32) -> (i32, i32) {
    %c0_i32 = arith.constant 0 : i32
    %c0_i32_0 = arith.constant 0 : i32
    return %arg0, %c0_i32 : i32, i32
  }
  func.func @transform_1(%arg0: i32, %arg1: i32) -> (i32, i32) {
    %c0_i32 = arith.constant 0 : i32
    %c0_i32_0 = arith.constant 0 : i32
    return %arg1, %c0_i32 : i32, i32
  }
  func.func @transform_2(%arg0: i32, %arg1: i32) -> (i32, i32, i32) {
    %c0_i32 = arith.constant 0 : i32
    %c0_i32_0 = arith.constant 0 : i32
    %c0_i32_1 = arith.constant 0 : i32
    return %arg0, %c0_i32, %c0_i32_0 : i32, i32, i32
  }
  func.func @transform_3(%arg0: i32, %arg1: i32) -> (i32, i32, i32) {
    %c0_i32 = arith.constant 0 : i32
    %c0_i32_0 = arith.constant 0 : i32
    return %arg0, %c0_i32, %arg1 : i32, i32, i32
  }
}

</mosaic_0001>

<bundles_post_ra>
// kernel: entropy_brm.1
= control target key start
LH: loop header
LB: loop body
LE: loop exit
PB: predicated region body
PF: predicated region fallthrough
CT: control target
= control target key end

     0   :  { %s1705_s0 = inlined_call_operand.vmem [shape: f32[16,128], index: 0, kind: input, shape index: {}]   ;;  %s1706_s1 = inlined_call_operand.vmem [shape: f32[128,128], index: 1, kind: input, shape index: {}]   ;;  %s1707_s2 = inlined_call_operand.hbm [shape: f32[1,1,128], index: 2, kind: output, shape index: {0}]   ;;  %s1708_s3 = inlined_call_operand.vmem [shape: f32[1,1,128], index: 3, kind: output, shape index: {1}]  }
   0x1   :  { %v16_v0 = vld [vmem:[%s1706_s1] sm:$0xff]  ;;  %v17_v1 = vld [vmem:[%s1706_s1 + $0x8] sm:$0xff]  ;;  %v18_v2 = vld [vmem:[%s1706_s1 + $0x10] sm:$0xff] }
   0x2   :  { %v33_v3 = vand.u32 4294901760, %v16_v0  ;;  %v36_v4 = vand.u32 4294901760, %v17_v1  ;;  %v19_v5 = vld [vmem:[%s1706_s1 + $0x18] sm:$0xff]  ;;  %v39_v6 = vand.u32 4294901760, %v18_v2  ;;  %v20_v10 = vld [vmem:[%s1706_s1 + $0x20] sm:$0xff]  ;;  %v21_v11 = vld [vmem:[%s1706_s1 + $0x28] sm:$0xff] }
   0x3   :  { %v42_v7 = vand.u32 4294901760, %v19_v5  ;;  %v14_v12 = vld [vmem:[%s1705_s0] sm:$0xff] }
   0x4   :  { %v1445_v8 = vpack.c.bf16 %v36_v4, %v33_v3  ;;  %v1462_v13 = vand.u32 4294901760, %v14_v12 }
   0x5   :  { %v1447_v9 = vpack.c.bf16 %v42_v7, %v39_v6 }
   0x6   :  { %1180 = vmatprep.subr.bf16.mxu1 %v1445_v8  ;;  %1276 = vmatprep.subr.bf16.mxu0 %v1445_v8 }
   0x7   :  { %1182 = vmatpush3.bf16.xpose.msra.mxu1 %v1445_v8  ;;  %1278 = vmatpush3.bf16.xpose.msra.mxu0 %v1445_v8 }
   0x8   :  { %9 = vsyncpa [#allocation4], 0  ;;  %1184 = vmatprep.subr.bf16.mxu1 %v1447_v9  ;;  %1280 = vmatprep.subr.bf16.mxu0 %v1447_v9  ;;  %v45_v14 = vand.u32 4294901760, %v20_v10  ;;  %v48_v15 = vand.u32 4294901760, %v21_v11  ;;  %v1467_v16 = vsub.f32 %v14_v12, %v1462_v13  ;;  %v22_v19 = vld [vmem:[%s1706_s1 + $0x30] sm:$0xff]  ;;  %v23_v20 = vld [vmem:[%s1706_s1 + $0x38] sm:$0xff]  ;;  %v1495_v30 = vsub.f32 %v16_v0, %v33_v3 }
   0x9   :  { %v51_v23 = vand.u32 4294901760, %v22_v19  ;;  %v54_v24 = vand.u32 4294901760, %v23_v20  ;;  %v24_v26 = vld [vmem:[%s1706_s1 + $0x40] sm:$0xff]  ;;  %v25_v27 = vld [vmem:[%s1706_s1 + $0x48] sm:$0xff]  ;;  %v1497_v31 = vsub.f32 %v17_v1, %v36_v4  ;;  %v1499_v32 = vsub.f32 %v18_v2, %v39_v6  ;;  %v26_v41 = vld [vmem:[%s1706_s1 + $0x50] sm:$0xff] }
   0xa   :  { %v115_v17 = vand.u32 4294901760, %v1467_v16  ;;  %v1470_v18 = vpack.c.bf16 %v48_v15, %v45_v14  ;;  %v57_v28 = vand.u32 4294901760, %v24_v26  ;;  %v60_v29 = vand.u32 4294901760, %v25_v27  ;;  %v27_v42 = vld [vmem:[%s1706_s1 + $0x58] sm:$0xff]  ;;  %v28_v51 = vld [vmem:[%s1706_s1 + $0x60] sm:$0xff]  ;;  %v29_v52 = vld [vmem:[%s1706_s1 + $0x68] sm:$0xff] }
   0xb   :  { %v1483_v25 = vpack.c.bf16 %v54_v24, %v51_v23  ;;  %v1501_v33 = vsub.f32 %v19_v5, %v42_v7  ;;  %v1503_v34 = vsub.f32 %v20_v10, %v45_v14  ;;  %v1505_v35 = vsub.f32 %v21_v11, %v48_v15  ;;  %v30_v59 = vld [vmem:[%s1706_s1 + $0x70] sm:$0xff]  ;;  %v31_v60 = vld [vmem:[%s1706_s1 + $0x78] sm:$0xff]  ;;  %v15_v63 = vld [vmem:[%s1705_s0 + $0x8] sm:$0xff] }
   0xc   :  { %v116_v21 = vsub.f32 %v1467_v16, %v115_v17  ;;  %1106 = vmatprep.mubr.f32.mxu0 %v115_v17  ;;  %v1509_v36 = vpack.c.bf16 %v1497_v31, %v1495_v30  ;;  %v1511_v37 = vpack.c.bf16 %v60_v29, %v57_v28  ;;  %v1513_v38 = vsub.f32 %v22_v19, %v51_v23 }
   0xd   :  { %v1515_v39 = vsub.f32 %v23_v20, %v54_v24  ;;  %v1519_v40 = vpack.c.bf16 %v1501_v33, %v1499_v32  ;;  %v1527_v43 = vsub.f32 %v24_v26, %v57_v28  ;;  %v1529_v44 = vsub.f32 %v25_v27, %v60_v29 }
   0xe   :  { %v117_v22 = vand.u32 4294901760, %v116_v21  ;;  %v1533_v45 = vpack.c.bf16 %v1505_v35, %v1503_v34  ;;  %v63_v48 = vand.u32 4294901760, %v26_v41  ;;  %v66_v49 = vand.u32 4294901760, %v27_v42 }
   0xf   :  { %1186 = vmatpush3.bf16.xpose.msra.mxu1 %v1447_v9  ;;  %1282 = vmatpush3.bf16.xpose.msra.mxu0 %v1447_v9  ;;  %v1537_v46 = vpack.c.bf16 %v1515_v39, %v1513_v38  ;;  %v1543_v47 = vpack.c.bf16 %v1529_v44, %v1527_v43  ;;  %v69_v56 = vand.u32 4294901760, %v28_v51  ;;  %v72_v57 = vand.u32 4294901760, %v29_v52 }
  0x10   :  { %1188 = vmatprep.subr.bf16.mxu1 %v1470_v18  ;;  %1284 = vmatprep.subr.bf16.mxu0 %v1470_v18  ;;  %v1547_v50 = vpack.c.bf16 %v66_v49, %v63_v48  ;;  %v1555_v53 = vsub.f32 %v26_v41, %v63_v48  ;;  %v1557_v54 = vsub.f32 %v27_v42, %v66_v49  ;;  %v75_v1 = vand.u32 4294901760, %v30_v59 }
  0x11   :  { %1001 = vmatprep.mubr.f32.mxu1 %v117_v22  ;;  %v1567_v58 = vpack.c.bf16 %v72_v57, %v69_v56  ;;  %v1575_v61 = vsub.f32 %v28_v51, %v69_v56  ;;  %v1577_v62 = vsub.f32 %v29_v52, %v72_v57  ;;  %v78_v2 = vand.u32 4294901760, %v31_v60 }
  0x12   :  { %v1563_v55 = vpack.c.bf16 %v1557_v54, %v1555_v53  ;;  %v136_v3 = vand.u32 4294901760, %v1495_v30  ;;  %v143_v4 = vand.u32 4294901760, %v1497_v31  ;;  %v1592_v5 = vand.u32 4294901760, %v15_v63 }
  0x13   :  { %v1586_v0 = vpack.c.bf16 %v1577_v62, %v1575_v61  ;;  %v1594_v6 = vpack.c.bf16 %v78_v2, %v75_v1  ;;  %v1598_v11 = vsub.f32 %v30_v59, %v75_v1  ;;  %v1600_v12 = vsub.f32 %v31_v60, %v78_v2 }
  0x14   :  { %v137_v7 = vsub.f32 %v1495_v30, %v136_v3  ;;  %v144_v10 = vsub.f32 %v1497_v31, %v143_v4  ;;  %v1603_v14 = vsub.f32 %v15_v63, %v1592_v5  ;;  %v150_v20 = vand.u32 4294901760, %v1499_v32 }
  0x15   :  { %v1609_v15 = vpack.c.bf16 %v1600_v12, %v1598_v11  ;;  %v157_v21 = vand.u32 4294901760, %v1501_v33  ;;  %v1307_v24 = vpack.c.bf16 %v143_v4, %v136_v3  ;;  %v164_v31 = vand.u32 4294901760, %v1503_v34 }
  0x16   :  { %v138_v17 = vand.u32 4294901760, %v137_v7  ;;  %v145_v19 = vand.u32 4294901760, %v144_v10  ;;  %v125_v22 = vand.u32 4294901760, %v1603_v14  ;;  %v151_v26 = vsub.f32 %v1499_v32, %v150_v20 }
  0x17   :  { %1190 = vmatpush3.bf16.xpose.msra.mxu1 %v1470_v18  ;;  %1286 = vmatpush3.bf16.xpose.msra.mxu0 %v1470_v18  ;;  %v158_v27 = vsub.f32 %v1501_v33, %v157_v21  ;;  %v171_v41 = vand.u32 4294901760, %v1505_v35  ;;  %v1311_v49 = vpack.c.bf16 %v157_v21, %v150_v20  ;;  %v165_v32 = vsub.f32 %v1503_v34, %v164_v31 }
  0x18   :  { %1192 = vmatprep.subr.bf16.mxu1 %v1483_v25  ;;  %1288 = vmatprep.subr.bf16.mxu0 %v1483_v25  ;;  %v1211_v23 = vpack.c.bf16 %v145_v19, %v138_v17  ;;  %v126_v28 = vsub.f32 %v1603_v14, %v125_v22  ;;  %v152_v29 = vand.u32 4294901760, %v151_v26  ;;  %v178_v56 = vand.u32 4294901760, %v1513_v38 }
  0x19   :  { %v159_v30 = vand.u32 4294901760, %v158_v27  ;;  %v172_v33 = vsub.f32 %v1505_v35, %v171_v41  ;;  %v166_v51 = vand.u32 4294901760, %v165_v32  ;;  %v185_v57 = vand.u32 4294901760, %v1515_v39 }
  0x1a   :  { %v127_v42 = vand.u32 4294901760, %v126_v28  ;;  %v1315_v34 = vpack.c.bf16 %v171_v41, %v164_v31  ;;  %v179_v35 = vsub.f32 %v1513_v38, %v178_v56  ;;  %v192_v2 = vand.u32 4294901760, %v1527_v43 }
  0x1b   :  { %v1215_v48 = vpack.c.bf16 %v159_v30, %v152_v29  ;;  %v173_v52 = vand.u32 4294901760, %v172_v33  ;;  %v186_v60 = vsub.f32 %v1515_v39, %v185_v57  ;;  %v199_v3 = vand.u32 4294901760, %v1529_v44 }
  0x1c   :  { %v180_v63 = vand.u32 4294901760, %v179_v35  ;;  %v1319_v7 = vpack.c.bf16 %v185_v57, %v178_v56  ;;  %v193_v10 = vsub.f32 %v1527_v43, %v192_v2  ;;  %v206_v19 = vand.u32 4294901760, %v1555_v53 }
  0x1d   :  { %v1219_v59 = vpack.c.bf16 %v173_v52, %v166_v51  ;;  %v187_v1 = vand.u32 4294901760, %v186_v60  ;;  %v200_v17 = vsub.f32 %v1529_v44, %v199_v3  ;;  %v213_v20 = vand.u32 4294901760, %v1557_v54 }
  0x1e   :  { %v194_v38 = vand.u32 4294901760, %v193_v10  ;;  %v220_v26 = vand.u32 4294901760, %v1575_v61  ;;  %v227_v27 = vand.u32 4294901760, %v1577_v62  ;;  %v234_v41 = vand.u32 4294901760, %v1598_v11 }
  0x1f   :  { %1194 = vmatpush3.bf16.xpose.msra.mxu1 %v1483_v25  ;;  %1290 = vmatpush3.bf16.xpose.msra.mxu0 %v1483_v25  ;;  %v1223_v4 = vpack.c.bf16 %v187_v1, %v180_v63  ;;  %v201_v39 = vand.u32 4294901760, %v200_v17  ;;  %v1327_v29 = vpack.c.bf16 %v213_v20, %v206_v19  ;;  %vm757_vm0 = vcmask 7168  }
  0x20   :  { %1196 = vmatprep.subr.bf16.mxu1 %v1511_v37  ;;  %1292 = vmatprep.subr.bf16.mxu0 %v1511_v37  ;;  %v221_v30 = vsub.f32 %v1575_v61, %v220_v26  ;;  %v228_v31 = vsub.f32 %v1577_v62, %v227_v27  ;;  %v235_v32 = vsub.f32 %v1598_v11, %v234_v41 }
  0x21   :  { %v1227_v21 = vpack.c.bf16 %v201_v39, %v194_v38 }
  0x22   :  { %v236_v61 = vand.u32 4294901760, %v235_v32 }
  0x27   :  { %1198 = vmatpush3.bf16.xpose.msra.mxu1 %v1511_v37  ;;  %1294 = vmatpush3.bf16.xpose.msra.mxu0 %v1511_v37 }
  0x28   :  { %1200 = vmatprep.subr.bf16.mxu1 %v1547_v50  ;;  %1296 = vmatprep.subr.bf16.mxu0 %v1547_v50 }
  0x2f   :  { %1202 = vmatpush3.bf16.xpose.msra.mxu1 %v1547_v50  ;;  %1298 = vmatpush3.bf16.xpose.msra.mxu0 %v1547_v50 }
  0x30   :  { %1204 = vmatprep.subr.bf16.mxu1 %v1567_v58  ;;  %1300 = vmatprep.subr.bf16.mxu0 %v1567_v58 }
  0x37   :  { %1206 = vmatpush3.bf16.xpose.msra.mxu1 %v1567_v58  ;;  %1302 = vmatpush3.bf16.xpose.msra.mxu0 %v1567_v58 }
  0x38   :  { %1208 = vmatprep.subr.bf16.mxu1 %v1594_v6  ;;  %1304 = vmatprep.subr.bf16.mxu0 %v1594_v6 }
  0x3f   :  { %1210 = vmatpush3.bf16.xpose.msra.mxu1 %v1594_v6  ;;  %1306 = vmatpush3.bf16.xpose.msra.mxu0 %v1594_v6 }
  0x40   :  { %1212 = vmatprep.subr.bf16.mxu1 %v1211_v23  ;;  %1308 = vmatprep.subr.bf16.mxu0 %v1307_v24 }
  0x46   :  { %1002 = vmatmul.mubr.f32.vlgmr.msra.gmra.mrb[0].mxu1 %v127_v42  ;;  %1107 = vmatmul.mubr.f32.vlgmr.msra.gmra.mrb[0].mxu0 %v125_v22  ;;  %v1323_v22 = vpack.c.bf16 %v199_v3, %v192_v2  ;;  %v241_v42 = vand.u32 4294901760, %v1600_v12 }
  0x47   :  { %1214 = vmatpush3.bf16.xpose.msra.mxu1 %v1211_v23  ;;  %1310 = vmatpush3.bf16.xpose.msra.mxu0 %v1307_v24  ;;  %v207_v23 = vsub.f32 %v1555_v53, %v206_v19  ;;  %v214_v24 = vsub.f32 %v1557_v54, %v213_v20  ;;  %v222_v53 = vand.u32 4294901760, %v221_v30  ;;  %v229_v54 = vand.u32 4294901760, %v228_v31 }
  0x48   :  { %1216 = vmatprep.subr.bf16.mxu1 %v1215_v48  ;;  %1312 = vmatprep.subr.bf16.mxu0 %v1311_v49  ;;  %v242_v33 = vsub.f32 %v1600_v12, %v241_v42  ;;  %v1335_v52 = vpack.c.bf16 %v241_v42, %v234_v41 }
  0x49   :  { %1036 = vmatprep.mubr.f32.mxu1 %v1462_v13  ;;  %1141 = vmatprep.mubr.f32.mxu0 %v1462_v13  ;;  %v208_v43 = vand.u32 4294901760, %v207_v23  ;;  %v215_v44 = vand.u32 4294901760, %v214_v24 }
  0x4a   :  { %v243_v62 = vand.u32 4294901760, %v242_v33 }
  0x4b   :  { %v1231_v28 = vpack.c.bf16 %v215_v44, %v208_v43 }
  0x4c   :  { %v1239_v51 = vpack.c.bf16 %v243_v62, %v236_v61 }
  0x4f   :  { %1218 = vmatpush3.bf16.xpose.msra.mxu1 %v1215_v48  ;;  %1314 = vmatpush3.bf16.xpose.msra.mxu0 %v1311_v49  ;;  %v1235_v48 = vpack.c.bf16 %v229_v54, %v222_v53  ;;  %v1331_v49 = vpack.c.bf16 %v227_v27, %v220_v26 }
  0x50   :  { %1220 = vmatprep.subr.bf16.mxu1 %v1219_v59  ;;  %1316 = vmatprep.subr.bf16.mxu0 %v1315_v34 }
  0x57   :  { %1222 = vmatpush3.bf16.xpose.msra.mxu1 %v1219_v59  ;;  %1318 = vmatpush3.bf16.xpose.msra.mxu0 %v1315_v34 }
  0x58   :  { %1224 = vmatprep.subr.bf16.mxu1 %v1223_v4  ;;  %1320 = vmatprep.subr.bf16.mxu0 %v1319_v7 }
  0x5f   :  { %1226 = vmatpush3.bf16.xpose.msra.mxu1 %v1223_v4  ;;  %1322 = vmatpush3.bf16.xpose.msra.mxu0 %v1319_v7 }
  0x60   :  { %1228 = vmatprep.subr.bf16.mxu1 %v1227_v21  ;;  %1324 = vmatprep.subr.bf16.mxu0 %v1323_v22 }
  0x67   :  { %1230 = vmatpush3.bf16.xpose.msra.mxu1 %v1227_v21  ;;  %1326 = vmatpush3.bf16.xpose.msra.mxu0 %v1323_v22 }
  0x68   :  { %1232 = vmatprep.subr.bf16.mxu1 %v1231_v28  ;;  %1328 = vmatprep.subr.bf16.mxu0 %v1327_v29 }
  0x6f   :  { %1234 = vmatpush3.bf16.xpose.msra.mxu1 %v1231_v28  ;;  %1330 = vmatpush3.bf16.xpose.msra.mxu0 %v1327_v29 }
  0x70   :  { %1236 = vmatprep.subr.bf16.mxu1 %v1235_v48  ;;  %1332 = vmatprep.subr.bf16.mxu0 %v1331_v49 }
  0x77   :  { %1238 = vmatpush3.bf16.xpose.msra.mxu1 %v1235_v48  ;;  %1334 = vmatpush3.bf16.xpose.msra.mxu0 %v1331_v49 }
  0x78   :  { %1240 = vmatprep.subr.bf16.mxu1 %v1239_v51  ;;  %1336 = vmatprep.subr.bf16.mxu0 %v1335_v52 }
  0x7f   :  { %1242 = vmatpush3.bf16.xpose.msra.mxu1 %v1239_v51  ;;  %1338 = vmatpush3.bf16.xpose.msra.mxu0 %v1335_v52 }
  0x80   :  { %1244 = vmatprep.subr.bf16.mxu1 %v1509_v36  ;;  %1340 = vmatprep.subr.bf16.mxu0 %v1445_v8 }
  0x86   :  { %1037 = vmatmul.mubr.f32.vlgmr.msra.gmra.mrb[0].mxu1 %v1592_v5  ;;  %1142 = vmatmul.mubr.f32.vlgmr.msra.gmra.mrb[0].mxu0 %v1592_v5 }
  0x87   :  { %1246 = vmatpush3.bf16.xpose.msra.mxu1 %v1509_v36  ;;  %1342 = vmatpush3.bf16.xpose.msra.mxu0 %v1445_v8  ;;  %v1411_v8 = vmov -1e+30  }
  0x88   :  { %1248 = vmatprep.subr.bf16.mxu1 %v1519_v40  ;;  %1344 = vmatprep.subr.bf16.mxu0 %v1447_v9  ;;  %758 = vst.msk [vmem:[#allocation2] sm:$0xff] %vm757_vm0, %v1411_v8  ;;  %759 = vst.msk [vmem:[#allocation2 + $0x8] sm:$0xff] %vm757_vm0, %v1411_v8 }
  0x89   :  { %1071 = vmatprep.mubr.f32.mxu1 %v1467_v16  ;;  %1176 = vmatprep.mubr.f32.mxu0 %v1462_v13 }
  0x8f   :  { %1250 = vmatpush3.bf16.xpose.msra.mxu1 %v1519_v40  ;;  %1346 = vmatpush3.bf16.xpose.msra.mxu0 %v1447_v9  ;;  %v779_v9 = vlaneseq }
  0x90   :  { %1252 = vmatprep.subr.bf16.mxu1 %v1533_v45  ;;  %1348 = vmatprep.subr.bf16.mxu0 %v1470_v18 }
  0x91   :  { %v780_v13 = vand.u32 127, %v779_v9 }
  0x93   :  { %vm783_vm1 = vcmp.lt.s32.totalorder %v780_v13, 16 }
  0x97   :  { %1254 = vmatpush3.bf16.xpose.msra.mxu1 %v1533_v45  ;;  %1350 = vmatpush3.bf16.xpose.msra.mxu0 %v1470_v18 }
  0x98   :  { %1256 = vmatprep.subr.bf16.mxu1 %v1537_v46  ;;  %1352 = vmatprep.subr.bf16.mxu0 %v1483_v25 }
  0x9f   :  { %1258 = vmatpush3.bf16.xpose.msra.mxu1 %v1537_v46  ;;  %1354 = vmatpush3.bf16.xpose.msra.mxu0 %v1483_v25  ;;  %v784_v25 = vsel %vm783_vm1, 0.0, %v1411_v8 }
  0xa0   :  { %1260 = vmatprep.subr.bf16.mxu1 %v1543_v47  ;;  %1356 = vmatprep.subr.bf16.mxu0 %v1511_v37 }
  0xa7   :  { %1262 = vmatpush3.bf16.xpose.msra.mxu1 %v1543_v47  ;;  %1358 = vmatpush3.bf16.xpose.msra.mxu0 %v1511_v37 }
  0xa8   :  { %1264 = vmatprep.subr.bf16.mxu1 %v1563_v55  ;;  %1360 = vmatprep.subr.bf16.mxu0 %v1547_v50 }
  0xaf   :  { %1266 = vmatpush3.bf16.xpose.msra.mxu1 %v1563_v55  ;;  %1362 = vmatpush3.bf16.xpose.msra.mxu0 %v1547_v50 }
  0xb0   :  { %1268 = vmatprep.subr.bf16.mxu1 %v1586_v0  ;;  %1364 = vmatprep.subr.bf16.mxu0 %v1567_v58 }
  0xb7   :  { %1270 = vmatpush3.bf16.xpose.msra.mxu1 %v1586_v0  ;;  %1366 = vmatpush3.bf16.xpose.msra.mxu0 %v1567_v58 }
  0xb8   :  { %1272 = vmatprep.subr.bf16.mxu1 %v1609_v15  ;;  %1368 = vmatprep.subr.bf16.mxu0 %v1594_v6 }
  0xbf   :  { %1274 = vmatpush3.bf16.xpose.msra.mxu1 %v1609_v15  ;;  %1370 = vmatpush3.bf16.xpose.msra.mxu0 %v1594_v6  ;;  %v785_v15 = vld [vmem:[#allocation2] sm:$0xff] }
  0xc6   :  { %1072 = vmatmul.mubr.f32.vlgmr.msra.gmra.mrb[0].mxu1 %v1603_v14  ;;  %1177 = vmatmul.mubr.f32.vlgmr.msra.gmra.mrb[0].mxu0 %v1592_v5  ;;  %v786_v14 = vld [vmem:[#allocation2 + $0x8] sm:$0xff] }
 0x199   :  { %v1073_v16 = vpop.f32.mrb[0].mxu1  ;;  %v1178_v18 = vpop.f32.mrb[0].mxu0 }
 0x19a   :  { %v1371_v36 = vadd.f32 %v1178_v18, %v1073_v16  ;;  %v390_v37 = vpop.f32.mrb[1].mxu1  ;;  %v706_v40 = vpop.f32.mrb[1].mxu0 }
 0x19b   :  { %v1372_v45 = vadd.f32 %v706_v40, %v390_v37 }
 0x19c   :  { %v744_v46 = vadd.f32 -1e+30, %v1371_v36  ;;  %v788_v47 = vadd.f32 %v1371_v36, %v784_v25 }
 0x19d   :  { %v787_v50 = vadd.f32 %v1372_v45, %v784_v25 }
 0x19e   :  { %v745_v55 = vmax.f32 %v1372_v45, %v744_v46  ;;  %791 = vmax.xlane.f32.xlu1 %v788_v47 }
 0x19f   :  { %789 = vmax.xlane.f32.xlu0 %v787_v50 }
 0x1a0   :  { %v746_v58 = vrot.slane %v745_v55, 4 }
 0x1a2   :  { %v747_v0 = vmax.f32 %v745_v55, %v746_v58 }
 0x1a4   :  { %v748_v5 = vrot.slane %v747_v0, 2 }
 0x1a6   :  { %v749_v6 = vmax.f32 %v747_v0, %v748_v5 }
 0x1a8   :  { %v750_v11 = vrot.slane %v749_v6, 1 }
 0x1aa   :  { %v751_v12 = vmax.f32 %v749_v6, %v750_v11 }
 0x1ac   :  { %752 = vst [vmem:[%s1708_s3] sm:$0x1] %v751_v12  ;;  %s1412_s3 = smov [#allocation3]  }
 0x1ad   :  { %s848_s21 = sshll.u32 %s1412_s3, 4  ;;  %s849_s21 = int_to_ptr.vmem [resolvable:$true] %s848_s21 }
 0x1ae   :  { %s1387_s24 = scalar_lea.vmem %s849_s21, 16  ;;  %s1391_s25 = scalar_lea.vmem %s849_s21, 32 }
 0x1af   :  { %p1388_p0 = scmp.ne.s32.totalorder %s849_s21, %s1387_s24  ;;  %p1392_p1 = scmp.lt.s32.totalorder %s849_s21, %s849_s21 }
 0x1b0   :  { %p1393_p2 = scmp.lt.s32.totalorder %s1391_s25, %s1387_s24 }
 0x1b2   :  { %p1394_p3 = por %p1393_p2, %p1392_p1 }
 0x1b4   :  { %p1395_p4 = pnand %p1394_p3, %p1388_p0 }
 0x22b   :  { %v792_v56 = vpop.xlane.xlu1 %791 }
 0x22c   :  { %v794_v57 = vmax.f32 %v786_v14, %v792_v56  ;;  %v790_v59 = vpop.xlane.xlu0 %789 }
 0x22d   :  { %v793_v34 = vmax.f32 %v785_v15, %v790_v59 }
 0x22e   :  { %797 = vst.msk [vmem:[#allocation2 + $0x8] sm:$0xff] %vm757_vm0, %v794_v57 }
 0x22f   :  { %796 = vst.msk [vmem:[#allocation2] sm:$0xff] %vm757_vm0, %v793_v34 }
 0x236   :  { %v798_v35 = vld [vmem:[#allocation2] sm:$0xff] }
 0x237   :  { %v811_v60 = vmul.f32 %v798_v35, %v798_v35 }
 0x239   :  { %v813_v63 = vsub.f32 0.0, %v811_v60 }
 0x23b   :  { %v815_v1 = vmul.f32 0.78125, %v813_v63 }
 0x23d   :  { %v860_v2 = vadd.f32 -0.695795, %v815_v1 }
 0x23f   :  { %v819_v3 = vmul.f32 1.442695, %v860_v2 }
 0x241   :  { %1385 = vpow2.f32 %v819_v3 }
 0x24b   :  { %v1386_v4 = vpop.eup %1385 }
 0x24c   :  { %v823_v7 = vmul.f32 %v1386_v4, %v860_v2 }
 0x24e   :  { %v827_v10 = vsel %vm757_vm0, %v823_v7, 0.0 }
 0x24f   :  { %830 = vadd.xlane.f32.xlu0 %v827_v10 }
 0x2dc   :  { %v831_v17 = vpop.xlane.xlu0 %830 }
 0x2dd   :  { %v832_v38 = vrot.slane %v831_v17, 4 }
 0x2df   :  { %v833_v39 = vadd.f32 %v832_v38, %v831_v17 }
 0x2e1   :  { %v834_v19 = vrot.slane %v833_v39, 2 }
 0x2e3   :  { %v835_v20 = vadd.f32 %v834_v19, %v833_v39 }
 0x2e5   :  { %v836_v21 = vrot.slane %v835_v20, 1 }
 0x2e7   :  { %v837_v22 = vadd.f32 %v836_v21, %v835_v20 }
 0x2e9   :  { %1381 = vpush %v837_v22 }
 0x31a   :  { %s1382_s22 = spop %1381 }
 0x31b   :  { %s839_s23 = ssub.f32 0.0, %s1382_s22 }
 0x31d   :  { %v840_v23 = vstv %s839_s23 }
 0x31e   :  { %841 = vst [vmem:[#allocation3] sm:$0x1] %v840_v23 }
 0x31f   :  { %1398 = shalt.err (!%p1395_p4)
}
 0x320   :  { %s1399_s28 = scalar_lea.hbm %s1707_s2, 16 }
 0x321   :  { %p1400_p5 = scmp.ne.s32.totalorder %s1707_s2, %s1399_s28  ;;  %p1403_p6 = scmp.lt.u32.totalorder %s1399_s28, %s1707_s2 }
 0x323   :  { %p1405_p7 = pnand %p1403_p6, %p1400_p5 }
 0x325   :  { %1408 = shalt.err (!%p1405_p7)
}
 0x326   :  { %851 = dma.vmem_to_hbm [thread:$0]  %s849_s21, 16, %s1707_s2, [#allocation4]  }
 0x327   :  { %1409 = dma.done.wait [#allocation4], 16  }
 0x328   :  { %1410 = vsyncadd [#allocation4], 4294967280 }
 0x329   :  { %859 = vsyncpa [#allocation4], 1 }

</bundles_post_ra>
